<compile_context>
chip_gen: v7x
topology: tpu7x:2x2x1
jax: 0.10.0
libtpu: 0.0.40
codegen_flags: <defaults>
</compile_context>

<pallas_src>
import functools
import math

import jax
import jax.numpy as jnp
from jax import lax
from jax.experimental import pallas as pl
from jax.experimental.pallas import tpu as pltpu


def _self_attention_kernel(ez_ref, wqkv_ref, o_ref, *, dim, mxu_dtype):
    bb, L, Dp = ez_ref.shape

    # One fused Q/K/V projection matmul over all bb*L rows:
    #   (bb*L, Dp) @ (Dp, 3*Dp)  -- weight is already transposed in the wrapper.
    ez = ez_ref[...].reshape(bb * L, Dp).astype(mxu_dtype)
    qkv = jnp.dot(ez, wqkv_ref[...], preferred_element_type=jnp.float32)

    q = qkv[:, 0 * Dp:1 * Dp].reshape(bb, L, Dp)
    k = qkv[:, 1 * Dp:2 * Dp].reshape(bb, L, Dp)
    v = qkv[:, 2 * Dp:3 * Dp].reshape(bb, L, Dp)

    # scores = Q K^T / sqrt(dim); contraction on the last axis of both (no
    # explicit transpose), scale applied in f32 after the MXU dot.
    s = jnp.einsum(
        "bqd,bkd->bqk",
        q.astype(mxu_dtype),
        k.astype(mxu_dtype),
        preferred_element_type=jnp.float32,
    ) * jnp.float32(1.0 / math.sqrt(dim))

    # Causal (lower-triangular) softmax. Mask is applied after the exp, which
    # is mathematically identical to filling masked scores with -2**32+1
    # (exp underflows to 0) but skips the giant constant and half the exps.
    rows = lax.broadcasted_iota(jnp.int32, (bb, L, L), 1)
    cols = lax.broadcasted_iota(jnp.int32, (bb, L, L), 2)
    m = jnp.max(s, axis=-1, keepdims=True)
    e = jnp.where(rows >= cols, jnp.exp(s - m), 0.0)
    denom = jnp.sum(e, axis=-1, keepdims=True)
    attn = e * pl.reciprocal(denom, approx=True)

    # a = attn @ V
    out = jnp.einsum(
        "bqk,bkd->bqd",
        attn.astype(mxu_dtype),
        v.astype(mxu_dtype),
        preferred_element_type=jnp.float32,
    )
    o_ref[...] = out.astype(o_ref.dtype)


def self_attention_pallas(Ez, z, Wq_stack, Wk_stack, Wv_stack, *,
                          mxu_dtype=jnp.float32, batch_block=None,
                          lane_multiple=128):
    """Forward pass of SelfAttention.forward(Ez, z).

    Ez       : (B, L, D) float32
    z        : STATIC Python int in [0, 5]; selects the weight triple outside
               the kernel (a traced z would break the Wq_stack[z] glue).
    W*_stack : (6, D, D) float32 nn.Linear weights (y = x @ W.T, no bias).
    mxu_dtype: dtype fed to the MXU dots (bf16 on v6e/v7x for 2x matmul
               throughput; accumulation is always f32).
    """
    B, L, D = Ez.shape
    bb = B if batch_block is None else batch_block
    assert B % bb == 0, "batch_block must divide the batch size"

    # Pad the feature dim to a lane-dense multiple of 128. Zero padding is
    # exactly semantics-preserving: padded lanes contribute 0 to every dot.
    Dp = ((D + lane_multiple - 1) // lane_multiple) * lane_multiple

    def pad_wT(w):  # (D, D) nn.Linear weight -> padded, transposed (Dp, Dp)
        return jnp.zeros((Dp, Dp), w.dtype).at[:D, :D].set(w.T)

    # Fused, pre-transposed projection matrix: x @ w_qkv == [xWq^T|xWk^T|xWv^T].
    w_qkv = jnp.concatenate(
        [pad_wT(Wq_stack[z]), pad_wT(Wk_stack[z]), pad_wT(Wv_stack[z])], axis=1
    ).astype(mxu_dtype)                                        # (Dp, 3*Dp)

    ez_p = jnp.zeros((B, L, Dp), Ez.dtype).at[:, :, :D].set(Ez)

    kernel = functools.partial(_self_attention_kernel, dim=D, mxu_dtype=mxu_dtype)

    out = pl.pallas_call(
        kernel,
        out_shape=jax.ShapeDtypeStruct((B, L, Dp), Ez.dtype),
        grid_spec=pltpu.PrefetchScalarGridSpec(
            num_scalar_prefetch=0,
            grid=(B // bb,),                       # single step at toy shapes
            in_specs=[
                pl.BlockSpec((bb, L, Dp), lambda i: (i, 0, 0)),
                # Full-array block + constant index map: weights DMA'd once.
                pl.BlockSpec((Dp, 3 * Dp), lambda i: (0, 0)),
            ],
            out_specs=pl.BlockSpec((bb, L, Dp), lambda i: (i, 0, 0)),
        ),
        compiler_params=pltpu.CompilerParams(
            dimension_semantics=("parallel",),
        ),
    )(ez_p, w_qkv)

    return out[:, :, :D]


def reference_self_attention(Ez, z, Wq_stack, Wk_stack, Wv_stack):
    """Pure-JAX reference mirroring the PyTorch forward (for sanity check)."""
    D = Ez.shape[-1]
    q = Ez @ Wq_stack[z].T
    k = Ez @ Wk_stack[z].T
    v = Ez @ Wv_stack[z].T
    scores = jnp.matmul(q, jnp.swapaxes(k, -1, -2)) / math.sqrt(D)
    L = scores.shape[-1]
    tril = jnp.tril(jnp.ones((L, L), scores.dtype))
    scores = jnp.where(tril[None] == 0, jnp.float32(-(2.0**32) + 1.0), scores)
    attn = jax.nn.softmax(scores, axis=-1)
    return jnp.matmul(attn, v)


if __name__ == "__main__":
    # Small shapes consistent with the module: batch=2, lmax=8, dim=32.
    B, L, D = 2, 8, 32
    key = jax.random.PRNGKey(0)
    k_ez, k_q, k_k, k_v = jax.random.split(key, 4)

    Ez = jax.random.normal(k_ez, (B, L, D), dtype=jnp.float32)

    # 6 weight triples as in the module's __init__ (nn.Linear default init).
    bound = 1.0 / math.sqrt(D)
    Wq_stack = jax.random.uniform(k_q, (6, D, D), jnp.float32, -bound, bound)
    Wk_stack = jax.random.uniform(k_k, (6, D, D), jnp.float32, -bound, bound)
    Wv_stack = jax.random.uniform(k_v, (6, D, D), jnp.float32, -bound, bound)

    z = 3  # rating in [0, 5] (static Python int)

    ref = reference_self_attention(Ez, z, Wq_stack, Wk_stack, Wv_stack)

    # f32 MXU-input path (tight check; approx reciprocal ~1e-4 rel error).
    out = jax.block_until_ready(
        self_attention_pallas(Ez, z, Wq_stack, Wk_stack, Wv_stack,
                              mxu_dtype=jnp.float32))
    assert out.shape == (B, L, D)
    assert jnp.allclose(out, ref, atol=2e-3, rtol=2e-3)

    # bf16 MXU-input / f32-accumulate path (v6e/v7x throughput; loose check).
    out_bf16 = jax.block_until_ready(
        self_attention_pallas(Ez, z, Wq_stack, Wk_stack, Wv_stack,
                              mxu_dtype=jnp.bfloat16))
    assert out_bf16.shape == (B, L, D)
    assert jnp.allclose(out_bf16, ref, atol=8e-2, rtol=8e-2)

    print("KERNEL_OK")
</pallas_src>

<mosaic_0001>
module attributes {stable_mosaic.version = 11 : i64} {
  func.func @_self_attention_kernel(%arg0: i32, %arg1: memref<2x8x128xf32, #tpu.memory_space<vmem>>, %arg2: memref<128x384xf32, #tpu.memory_space<vmem>>, %arg3: memref<2x8x128xf32, #tpu.memory_space<vmem>>) attributes {dimension_semantics = [#tpu.dimension_semantics<parallel>], iteration_bounds = array<i64: 1>, scalar_prefetch = 0 : i64, scratch_operands = 0 : i64, tpu.core_type = #tpu.core_type<tc>, window_params = [{transform_indices = @transform_0, window_bounds = array<i64: 2, 8, 128>}, {pipeline_mode = #tpu.pipeline_mode<synchronous>, transform_indices = @transform_1, window_bounds = array<i64: 128, 384>}, {transform_indices = @transform_2, window_bounds = array<i64: 2, 8, 128>}]} {
    %c0 = arith.constant 0 : index
    %c0_0 = arith.constant 0 : index
    %c0_1 = arith.constant 0 : index
    %0 = vector.load %arg1[%c0, %c0_0, %c0_1] : memref<2x8x128xf32, #tpu.memory_space<vmem>>, vector<2x8x128xf32>
    %1 = vector.shape_cast %0 : vector<2x8x128xf32> to vector<16x128xf32>
    %c0_2 = arith.constant 0 : index
    %c0_3 = arith.constant 0 : index
    %2 = vector.load %arg2[%c0_2, %c0_3] : memref<128x384xf32, #tpu.memory_space<vmem>>, vector<128x384xf32>
    %cst = arith.constant dense<0.000000e+00> : vector<16x384xf32>
    %3 = tpu.matmul %1, %2, %cst {dimension_numbers = #tpu.dot_dimension_numbers<[1], [0], [0], [1], [0, 0, 1, 1], [], []>} : vector<16x128xf32>, vector<128x384xf32>, vector<16x384xf32> -> vector<16x384xf32>
    %4 = vector.extract_strided_slice %3 {offsets = [0, 0], sizes = [16, 128], strides = [1, 1]} : vector<16x384xf32> to vector<16x128xf32>
    %5 = vector.shape_cast %4 : vector<16x128xf32> to vector<2x8x128xf32>
    %6 = vector.extract_strided_slice %3 {offsets = [0, 128], sizes = [16, 128], strides = [1, 1]} : vector<16x384xf32> to vector<16x128xf32>
    %7 = vector.shape_cast %6 : vector<16x128xf32> to vector<2x8x128xf32>
    %8 = vector.extract_strided_slice %3 {offsets = [0, 256], sizes = [16, 128], strides = [1, 1]} : vector<16x384xf32> to vector<16x128xf32>
    %9 = vector.shape_cast %8 : vector<16x128xf32> to vector<2x8x128xf32>
    "tpu.trace_start"() <{level = 10 : i32, message = "bqd,bkd->bqk"}> : () -> ()
    %cst_4 = arith.constant dense<0.000000e+00> : vector<2x8x8xf32>
    %10 = tpu.matmul %5, %7, %cst_4 {dimension_numbers = #tpu.dot_dimension_numbers<[2], [2], [1], [1], [0, 0, 0, 1, 1, 1], [0], [0]>} : vector<2x8x128xf32>, vector<2x8x128xf32>, vector<2x8x8xf32> -> vector<2x8x8xf32>
    "tpu.trace_stop"() : () -> ()
    %cst_5 = arith.constant 0.176776692 : f32
    %11 = vector.broadcast %cst_5 : f32 to vector<2x8x8xf32>
    %12 = arith.mulf %10, %11 : vector<2x8x8xf32>
    %13 = tpu.iota {dimensions = array<i32: 1>} : vector<2x8x8xi32>
    %14 = tpu.iota {dimensions = array<i32: 2>} : vector<2x8x8xi32>
    %cst_6 = arith.constant dense<0xFF800000> : vector<2x8xf32>
    %15 = vector.multi_reduction <maximumf>, %12, %cst_6 [2] : vector<2x8x8xf32> to vector<2x8xf32>
    %16 = vector.shape_cast %15 : vector<2x8xf32> to vector<2x8x1xf32>
    %17 = arith.cmpi sge, %13, %14 : vector<2x8x8xi32>
    %18 = vector.broadcast %16 : vector<2x8x1xf32> to vector<2x8x8xf32>
    %19 = arith.subf %12, %18 : vector<2x8x8xf32>
    %20 = math.exp %19 : vector<2x8x8xf32>
    %cst_7 = arith.constant 0.000000e+00 : f32
    %21 = vector.broadcast %cst_7 : f32 to vector<2x8x8xf32>
    %22 = arith.select %17, %20, %21 : vector<2x8x8xi1>, vector<2x8x8xf32>
    %cst_8 = arith.constant dense<0.000000e+00> : vector<2x8xf32>
    %23 = vector.multi_reduction <add>, %22, %cst_8 [2] : vector<2x8x8xf32> to vector<2x8xf32>
    %24 = vector.shape_cast %23 : vector<2x8xf32> to vector<2x8x1xf32>
    %25 = tpu.reciprocal %24 {approx = true} : vector<2x8x1xf32> -> vector<2x8x1xf32>
    %26 = vector.broadcast %25 : vector<2x8x1xf32> to vector<2x8x8xf32>
    %27 = arith.mulf %22, %26 : vector<2x8x8xf32>
    "tpu.trace_start"() <{level = 10 : i32, message = "bqk,bkd->bqd"}> : () -> ()
    %cst_9 = arith.constant dense<0.000000e+00> : vector<2x8x128xf32>
    %28 = tpu.matmul %27, %9, %cst_9 {dimension_numbers = #tpu.dot_dimension_numbers<[2], [1], [1], [2], [0, 0, 0, 1, 1, 2], [0], [0]>} : vector<2x8x8xf32>, vector<2x8x128xf32>, vector<2x8x128xf32> -> vector<2x8x128xf32>
    "tpu.trace_stop"() : () -> ()
    %c0_10 = arith.constant 0 : index
    %c0_11 = arith.constant 0 : index
    %c0_12 = arith.constant 0 : index
    %29 = vector.load %arg3[%c0_10, %c0_11, %c0_12] : memref<2x8x128xf32, #tpu.memory_space<vmem>>, vector<2x8x128xf32>
    tpu.vector_store %arg3[%c0_10, %c0_11, %c0_12], %28 {strides = array<i32>} : memref<2x8x128xf32, #tpu.memory_space<vmem>>, vector<2x8x128xf32>,
    return
  }
  func.func @transform_0(%arg0: i32) -> (i32, i32, i32) {
    %c0_i32 = arith.constant 0 : i32
    %c0_i32_0 = arith.constant 0 : i32
    %c0_i32_1 = arith.constant 0 : i32
    return %arg0, %c0_i32, %c0_i32_0 : i32, i32, i32
  }
  func.func @transform_1(%arg0: i32) -> (i32, i32) {
    %c0_i32 = arith.constant 0 : i32
    %c0_i32_0 = arith.constant 0 : i32
    %c0_i32_1 = arith.constant 0 : i32
    return %c0_i32, %c0_i32_0 : i32, i32
  }
  func.func @transform_2(%arg0: i32) -> (i32, i32, i32) {
    %c0_i32 = arith.constant 0 : i32
    %c0_i32_0 = arith.constant 0 : i32
    %c0_i32_1 = arith.constant 0 : i32
    return %arg0, %c0_i32, %c0_i32_0 : i32, i32, i32
  }
}

</mosaic_0001>

<bundles_post_ra>
// kernel: tpu_custom_call.1
= control target key start
LH: loop header
LB: loop body
LE: loop exit
PB: predicated region body
PF: predicated region fallthrough
CT: control target
= control target key end

     0   :  { %7 = vsyncpa [#allocation3], 0  ;;  %s902_s0 = inlined_call_operand.hbm [shape: f32[2,8,128], index: 0, kind: input, shape index: {}]   ;;  %s903_s1 = inlined_call_operand.hbm [shape: f32[128,384], index: 1, kind: input, shape index: {}]   ;;  %s904_s2 = inlined_call_operand.hbm [shape: f32[2,8,128], index: 2, kind: output, shape index: {}]  }
   0x1   :  { %8 = vsyncpa [#allocation6], 0 }
   0x2   :  { %9 = vsyncpa [#allocation4], 0  ;;  %s816_s9 = smov [#allocation2]   ;;  %s744_s13 = scalar_lea.hbm %s902_s0, 256 }
   0x3   :  { %s15_s10 = sshll.u32 %s816_s9, 4  ;;  %p745_p0 = scmp.ne.s32.totalorder %s902_s0, %s744_s13  ;;  %s16_s10 = int_to_ptr.vmem [resolvable:$true] %s15_s10 }
   0x4   :  { %p748_p1 = scmp.lt.u32.totalorder %s744_s13, %s902_s0 }
   0x6   :  { %p750_p2 = pnand %p748_p1, %p745_p0 }
   0x8   :  { %753 = shalt.err (!%p750_p2)
}
   0x9   :  { %s754_s18 = scalar_lea.vmem %s16_s10, 256  ;;  %p759_p4 = scmp.lt.s32.totalorder %s16_s10, %s16_s10 }
   0xa   :  { %p755_p3 = scmp.ne.s32.totalorder %s16_s10, %s754_s18  ;;  %p760_p5 = scmp.lt.s32.totalorder %s754_s18, %s754_s18 }
   0xc   :  { %p761_p6 = por %p760_p5, %p759_p4 }
   0xe   :  { %p762_p7 = pnand %p761_p6, %p755_p3 }
  0x10   :  { %765 = shalt.err (!%p762_p7)
}
  0x11   :  { %s817_s19 = smov 128   ;;  %s818_s20 = smov 8  }
  0x12   :  { %21 = dma.hbm_to_vmem [thread:$0]  %s902_s0, 256, %s16_s10, [#allocation3], %s817_s19, %s817_s19, %s818_s20  }
  0x13   :  { %s819_s23 = smov [#allocation5]   ;;  %s766_s27 = scalar_lea.hbm %s903_s1, 6144 }
  0x14   :  { %s27_s24 = sshll.u32 %s819_s23, 4  ;;  %p767_p8 = scmp.ne.s32.totalorder %s903_s1, %s766_s27  ;;  %s28_s24 = int_to_ptr.vmem [resolvable:$true] %s27_s24 }
  0x15   :  { %p770_p9 = scmp.lt.u32.totalorder %s766_s27, %s903_s1 }
  0x17   :  { %p772_p10 = pnand %p770_p9, %p767_p8 }
  0x19   :  { %775 = shalt.err (!%p772_p10)
}
  0x1a   :  { %s776_s4 = scalar_lea.vmem %s28_s24, 6144  ;;  %p781_p12 = scmp.lt.s32.totalorder %s28_s24, %s28_s24 }
  0x1b   :  { %p777_p11 = scmp.ne.s32.totalorder %s28_s24, %s776_s4  ;;  %p782_p13 = scmp.lt.s32.totalorder %s776_s4, %s776_s4 }
  0x1d   :  { %p783_p0 = por %p782_p13, %p781_p12 }
  0x1f   :  { %p784_p1 = pnand %p783_p0, %p777_p11 }
  0x21   :  { %787 = shalt.err (!%p784_p1)
}
  0x22   :  { %s820_s0 = smov 384   ;;  %s821_s5 = smov 24  }
  0x23   :  { %33 = dma.hbm_to_vmem [thread:$0]  %s903_s1, 6144, %s28_s24, [#allocation6], %s820_s0, %s820_s0, %s821_s5  }
  0x24   :  { %810 = dma.done.wait [#allocation3], 256  }
  0x25   :  { %811 = vsyncadd [#allocation3], 4294967040 }
  0x26   :  { %812 = dma.done.wait [#allocation6], 6144  }
  0x27   :  { %813 = vsyncadd [#allocation6], 4294961152  ;;  %v822_v0 = vmov 0.0   ;;  %v43_v1 = vld [vmem:[#allocation5 + $0x8] sm:$0xff]  ;;  %v46_v2 = vld [vmem:[#allocation5 + $0x20] sm:$0xff]  ;;  %vm823_vm0 = vmmov 0  }
  0x28   :  { %154 = vmatprep.mubr.f32.mxu0 %v822_v0  ;;  %v42_v3 = vld [vmem:[#allocation5] sm:$0xff]  ;;  %v663_v4 = vpack.c.bf16 %v46_v2, %v43_v1  ;;  %v45_v5 = vld [vmem:[#allocation5 + $0x18] sm:$0xff]  ;;  %v52_v7 = vld [vmem:[#allocation5 + $0x50] sm:$0xff]  ;;  %vm388_vm1 = vcmask 64512   ;;  %s824_s1 = smov [#allocation7]  }
  0x29   :  { %v49_v6 = vld [vmem:[#allocation5 + $0x38] sm:$0xff]  ;;  %v665_v8 = vpack.c.bf16 %v45_v5, %v42_v3  ;;  %v48_v10 = vld [vmem:[#allocation5 + $0x30] sm:$0xff]  ;;  %v51_v11 = vld [vmem:[#allocation5 + $0x48] sm:$0xff]  ;;  %s567_s8 = sshll.u32 %s824_s1, 4  ;;  %s568_s8 = int_to_ptr.vmem [resolvable:$true] %s567_s8 }
  0x2a   :  { %v667_v9 = vpack.c.bf16 %v52_v7, %v49_v6  ;;  %v55_v12 = vld [vmem:[#allocation5 + $0x68] sm:$0xff]  ;;  %664 = vmatprep.subr.bf16.mxu0 %v663_v4  ;;  %v58_v13 = vld [vmem:[#allocation5 + $0x80] sm:$0xff]  ;;  %v669_v14 = vpack.c.bf16 %v51_v11, %v48_v10  ;;  %v57_v17 = vld [vmem:[#allocation5 + $0x78] sm:$0xff]  ;;  %s788_s9 = scalar_lea.vmem %s568_s8, 256  ;;  %p793_p3 = scmp.lt.s32.totalorder %s568_s8, %s568_s8 }
  0x2b   :  { %666 = vmatpush1.bf16.msra.mxu0 %v665_v8  ;;  %v671_v15 = vpack.c.bf16 %v58_v13, %v55_v12  ;;  %v54_v16 = vld [vmem:[#allocation5 + $0x60] sm:$0xff]  ;;  %v61_v18 = vld [vmem:[#allocation5 + $0x98] sm:$0xff]  ;;  %v64_v19 = vld [vmem:[#allocation5 + $0xb0] sm:$0xff]  ;;  %p789_p2 = scmp.ne.s32.totalorder %s568_s8, %s788_s9  ;;  %p794_p4 = scmp.lt.s32.totalorder %s788_s9, %s788_s9 }
  0x2c   :  { %668 = vmatprep.subr.bf16.mxu0 %v667_v9  ;;  %v673_v20 = vpack.c.bf16 %v57_v17, %v54_v16  ;;  %v675_v21 = vpack.c.bf16 %v64_v19, %v61_v18  ;;  %v60_v22 = vld [vmem:[#allocation5 + $0x90] sm:$0xff]  ;;  %v63_v23 = vld [vmem:[#allocation5 + $0xa8] sm:$0xff]  ;;  %v70_v25 = vld [vmem:[#allocation5 + $0xe0] sm:$0xff] }
  0x2d   :  { %v67_v24 = vld [vmem:[#allocation5 + $0xc8] sm:$0xff]  ;;  %v868_v26 = vld [vmem:[#allocation2] sm:$0xff]  ;;  %v677_v29 = vpack.c.bf16 %v63_v23, %v60_v22  ;;  %v66_v30 = vld [vmem:[#allocation5 + $0xc0] sm:$0xff]  ;;  %p795_p5 = por %p794_p4, %p793_p3 }
  0x2e   :  { %v44_v27 = vld [vmem:[#allocation5 + $0x10] sm:$0xff]  ;;  %v47_v28 = vld [vmem:[#allocation5 + $0x28] sm:$0xff]  ;;  %640 = vmatprep.mubr.f32.mxu1 %v868_v26  ;;  %v50_v32 = vld [vmem:[#allocation5 + $0x40] sm:$0xff]  ;;  %v679_v34 = vpack.c.bf16 %v70_v25, %v67_v24 }
  0x2f   :  { %670 = vmatpush1.bf16.msra.mxu0 %v669_v14  ;;  %v695_v31 = vpack.c.bf16 %v47_v28, %v44_v27  ;;  %v53_v33 = vld [vmem:[#allocation5 + $0x58] sm:$0xff]  ;;  %v56_v37 = vld [vmem:[#allocation5 + $0x70] sm:$0xff]  ;;  %v59_v38 = vld [vmem:[#allocation5 + $0x88] sm:$0xff]  ;;  %p796_p6 = pnand %p795_p5, %p789_p2 }
  0x30   :  { %672 = vmatprep.subr.bf16.mxu0 %v671_v15  ;;  %v69_v35 = vld [vmem:[#allocation5 + $0xd8] sm:$0xff]  ;;  %v699_v36 = vpack.c.bf16 %v53_v33, %v50_v32  ;;  %v76_v40 = vld [vmem:[#allocation5 + $0x110] sm:$0xff]  ;;  %v703_v43 = vpack.c.bf16 %v59_v38, %v56_v37  ;;  %v75_v45 = vld [vmem:[#allocation5 + $0x108] sm:$0xff] }
  0x31   :  { %v73_v39 = vld [vmem:[#allocation5 + $0xf8] sm:$0xff]  ;;  %696 = vmatprep.subr.bf16.mxu1 %v695_v31  ;;  %v681_v41 = vpack.c.bf16 %v69_v35, %v66_v30  ;;  %v72_v42 = vld [vmem:[#allocation5 + $0xf0] sm:$0xff]  ;;  %v62_v46 = vld [vmem:[#allocation5 + $0xa0] sm:$0xff]  ;;  %v384_v30 = vlaneseq }
  0x32   :  { %698 = vmatpush3.bf16.msra.mxu1 %v695_v31  ;;  %v683_v44 = vpack.c.bf16 %v76_v40, %v73_v39  ;;  %v65_v47 = vld [vmem:[#allocation5 + $0xb8] sm:$0xff]  ;;  %v79_v48 = vld [vmem:[#allocation5 + $0x128] sm:$0xff]  ;;  %v82_v49 = vld [vmem:[#allocation5 + $0x140] sm:$0xff]  ;;  %v685_v50 = vpack.c.bf16 %v75_v45, %v72_v42 }
  0x33   :  { %674 = vmatpush1.bf16.msra.mxu0 %v673_v20  ;;  %700 = vmatprep.subr.bf16.mxu1 %v699_v36  ;;  %v78_v51 = vld [vmem:[#allocation5 + $0x120] sm:$0xff]  ;;  %v707_v52 = vpack.c.bf16 %v65_v47, %v62_v46  ;;  %v687_v53 = vpack.c.bf16 %v82_v49, %v79_v48  ;;  %v81_v54 = vld [vmem:[#allocation5 + $0x138] sm:$0xff]  ;;  %v68_v55 = vld [vmem:[#allocation5 + $0xd0] sm:$0xff]  ;;  %v385_v32 = vshrl.u32 %v384_v30, 7  ;;  %v387_v33 = vand.u32 127, %v384_v30 }
  0x34   :  { %676 = vmatprep.subr.bf16.mxu0 %v675_v21  ;;  %v71_v56 = vld [vmem:[#allocation5 + $0xe8] sm:$0xff]  ;;  %v85_v57 = vld [vmem:[#allocation5 + $0x158] sm:$0xff]  ;;  %v88_v58 = vld [vmem:[#allocation5 + $0x170] sm:$0xff]  ;;  %v689_v59 = vpack.c.bf16 %v81_v54, %v78_v51 }
  0x35   :  { %v84_v60 = vld [vmem:[#allocation5 + $0x150] sm:$0xff]  ;;  %v711_v61 = vpack.c.bf16 %v71_v56, %v68_v55  ;;  %v691_v62 = vpack.c.bf16 %v88_v58, %v85_v57  ;;  %v87_v63 = vld [vmem:[#allocation5 + $0x168] sm:$0xff]  ;;  %v74_v1 = vld [vmem:[#allocation5 + $0x100] sm:$0xff]  ;;  %vm395_vm2 = vcmp.ge.s32.totalorder %v385_v32, %v387_v33 }
  0x36   :  { %702 = vmatpush3.bf16.msra.mxu1 %v699_v36  ;;  %v77_v2 = vld [vmem:[#allocation5 + $0x118] sm:$0xff]  ;;  %v693_v3 = vpack.c.bf16 %v87_v63, %v84_v60  ;;  %v80_v5 = vld [vmem:[#allocation5 + $0x130] sm:$0xff]  ;;  %v83_v6 = vld [vmem:[#allocation5 + $0x148] sm:$0xff] }
  0x37   :  { %678 = vmatpush1.bf16.msra.mxu0 %v677_v29  ;;  %704 = vmatprep.subr.bf16.mxu1 %v703_v43  ;;  %v715_v4 = vpack.c.bf16 %v77_v2, %v74_v1  ;;  %v719_v7 = vpack.c.bf16 %v83_v6, %v80_v5  ;;  %v86_v8 = vld [vmem:[#allocation5 + $0x160] sm:$0xff]  ;;  %v89_v9 = vld [vmem:[#allocation5 + $0x178] sm:$0xff] }
  0x38   :  { %680 = vmatprep.subr.bf16.mxu0 %v679_v34  ;;  %v41_v10 = vld [vmem:[#allocation2 + $0x8] sm:$0xff]  ;;  %v723_v11 = vpack.c.bf16 %v89_v9, %v86_v8 }
  0x3a   :  { %706 = vmatpush3.bf16.msra.mxu1 %v703_v43 }
  0x3b   :  { %682 = vmatpush1.bf16.msra.mxu0 %v681_v41  ;;  %708 = vmatprep.subr.bf16.mxu1 %v707_v52 }
  0x3c   :  { %684 = vmatprep.subr.bf16.mxu0 %v683_v44 }
  0x3e   :  { %710 = vmatpush3.bf16.msra.mxu1 %v707_v52 }
  0x3f   :  { %686 = vmatpush1.bf16.msra.mxu0 %v685_v50  ;;  %712 = vmatprep.subr.bf16.mxu1 %v711_v61 }
  0x40   :  { %688 = vmatprep.subr.bf16.mxu0 %v687_v53 }
  0x42   :  { %714 = vmatpush3.bf16.msra.mxu1 %v711_v61 }
  0x43   :  { %690 = vmatpush1.bf16.msra.mxu0 %v689_v59  ;;  %716 = vmatprep.subr.bf16.mxu1 %v715_v4 }
  0x44   :  { %692 = vmatprep.subr.bf16.mxu0 %v691_v62 }
  0x46   :  { %718 = vmatpush3.bf16.msra.mxu1 %v715_v4 }
  0x47   :  { %694 = vmatpush1.bf16.msra.mxu0 %v693_v3  ;;  %720 = vmatprep.subr.bf16.mxu1 %v719_v7 }
  0x48   :  { %648 = vmatprep.subr.mxu0 %v822_v0 }
  0x4a   :  { %155 = vmatmul.mubr.f32.vlgmr.msra.gmra.mrb[0].mxu0 %v868_v26  ;;  %722 = vmatpush3.bf16.msra.mxu1 %v719_v7 }
  0x4b   :  { %160 = vmatprep.mubr.f32.mxu0 %v822_v0  ;;  %724 = vmatprep.subr.bf16.mxu1 %v723_v11 }
  0x4e   :  { %161 = vmatmul.mubr.f32.gmra.mrb[2].mxu0 %v41_v10  ;;  %726 = vmatpush3.bf16.msra.mxu1 %v723_v11 }
  0x4f   :  { %643 = vmatprep.subr.mxu1 %v822_v0  ;;  %650 = vmatprep.mubr.msk.f32.mxu0 %vm823_vm0, %v822_v0 }
  0x51   :  { %641 = vmatmul.mubr.f32.vlgmr.msra.gmra.mrb[0].mxu1 %v41_v10 }
  0x52   :  { %645 = vmatprep.mubr.msk.f32.mxu1 %vm823_vm0, %v822_v0 }
 0x11d   :  { %v156_v12 = vpop.f32.mrb[0].mxu0 }
 0x11e   :  { %v158_v13 = vpop.f32.mrb[1].mxu0 }
 0x11f   :  { %644 = vmatpush3.xpose.msra.mxu1 %v158_v13 }
 0x120   :  { %653 = vmatprep.subr.mxu1 %v822_v0 }
 0x121   :  { %v162_v14 = vpop.f32.mrb[2].mxu0 }
 0x122   :  { %v164_v15 = vpop.f32.mrb[3].mxu0  ;;  %646 = vmatmul.mubr.f32.vlgmr.msra.gmra.mrb[2].mxu1 %v156_v12 }
 0x123   :  { %649 = vmatpush3.xpose.msra.mxu0 %v164_v15  ;;  %655 = vmatprep.mubr.msk.f32.mxu1 %vm823_vm0, %v822_v0 }
 0x124   :  { %658 = vmatprep.subr.mxu0 %v822_v0  ;;  %v642_v16 = vpop.f32.mrb[0].mxu1 }
 0x125   :  { %v233_v17 = vpop.f32.mrb[1].mxu1 }
 0x126   :  { %651 = vmatmul.mubr.f32.vlgmr.msra.gmra.mrb[4].mxu0 %v162_v14  ;;  %654 = vmatpush3.msra.mxu1 %v233_v17 }
 0x127   :  { %660 = vmatprep.mubr.msk.f32.mxu0 %vm823_vm0, %v822_v0  ;;  %659 = vmatpush3.msra.mxu0 %v642_v16 }
 0x1f5   :  { %v308_v18 = vpop.f32.mrb[2].mxu1 }
 0x1f6   :  { %v382_v19 = vmul.f32 0.17677669, %v308_v18  ;;  %v647_v20 = vpop.f32.mrb[3].mxu1 }
 0x1f8   :  { %v389_v21 = vsel %vm388_vm1, %v382_v19, -inf }
 0x1f9   :  { %390 = vmax.xlane.f32.xlu0 %v389_v21  ;;  %v378_v22 = vpop.f32.mrb[4].mxu0 }
 0x1fa   :  { %v383_v23 = vmul.f32 0.17677669, %v378_v22  ;;  %v652_v24 = vpop.f32.mrb[5].mxu0 }
 0x1fc   :  { %v392_v25 = vsel %vm388_vm1, %v383_v23, -inf }
 0x1fd   :  { %393 = vmax.xlane.f32.xlu0 %v392_v25 }
 0x286   :  { %v391_v26 = vpop.xlane.xlu0 %390 }
 0x287   :  { %v396_v27 = vsub.f32 %v382_v19, %v391_v26 }
 0x289   :  { %v398_v0 = vmul.f32 1.442695, %v396_v27 }
 0x28a   :  { %v394_v28 = vpop.xlane.xlu0 %393 }
 0x28b   :  { %736 = vpow2.f32 %v398_v0  ;;  %v397_v29 = vsub.f32 %v383_v23, %v394_v28 }
 0x28d   :  { %v400_v31 = vmul.f32 1.442695, %v397_v29 }
 0x28f   :  { %738 = vpow2.f32 %v400_v31 }
 0x295   :  { %v737_v34 = vpop.eup %736 }
 0x296   :  { %v402_v35 = vsel %vm395_vm2, %v737_v34, 0.0 }
 0x297   :  { %v404_v36 = vsel %vm388_vm1, %v402_v35, 0.0 }
 0x298   :  { %405 = vadd.xlane.f32.xlu1 %v404_v36 }
 0x299   :  { %v739_v37 = vpop.eup %738 }
 0x29a   :  { %v403_v38 = vsel %vm395_vm2, %v739_v37, 0.0 }
 0x29b   :  { %v407_v39 = vsel %vm388_vm1, %v403_v38, 0.0 }
 0x29c   :  { %408 = vadd.xlane.f32.xlu1 %v407_v39 }
 0x325   :  { %v406_v40 = vpop.xlane.xlu1 %405 }
 0x326   :  { %740 = vrcp.f32 %v406_v40 }
 0x329   :  { %v409_v41 = vpop.xlane.xlu1 %408 }
 0x32a   :  { %742 = vrcp.f32 %v409_v41 }
 0x330   :  { %v741_v42 = vpop.eup %740 }
 0x331   :  { %v412_v43 = vmul.f32 %v741_v42, %v402_v35 }
 0x333   :  { %656 = vmatmul.mubr.msk.f32.vlgmr.msra.gmra.mrb[4].mxu1 %vm388_vm1, %v412_v43 }
 0x334   :  { %v743_v44 = vpop.eup %742 }
 0x335   :  { %v413_v45 = vmul.f32 %v743_v44, %v403_v38 }
 0x337   :  { %661 = vmatmul.mubr.msk.f32.vlgmr.msra.gmra.mrb[6].mxu0 %vm388_vm1, %v413_v45 }
 0x406   :  { %v483_v46 = vpop.f32.mrb[4].mxu1 }
 0x407   :  { %560 = vst [vmem:[#allocation7] sm:$0xff] %v483_v46  ;;  %v657_v47 = vpop.f32.mrb[5].mxu1 }
 0x40a   :  { %v556_v48 = vpop.f32.mrb[6].mxu0 }
 0x40b   :  { %561 = vst [vmem:[#allocation7 + $0x8] sm:$0xff] %v556_v48  ;;  %v662_v49 = vpop.f32.mrb[7].mxu0 }
 0x40c   :  { %799 = shalt.err (!%p796_p6)
}
 0x40d   :  { %s800_s12 = scalar_lea.hbm %s904_s2, 256 }
 0x40e   :  { %p801_p7 = scmp.ne.s32.totalorder %s904_s2, %s800_s12  ;;  %p804_p8 = scmp.lt.u32.totalorder %s800_s12, %s904_s2 }
 0x410   :  { %p806_p9 = pnand %p804_p8, %p801_p7 }
 0x412   :  { %809 = shalt.err (!%p806_p9)
}
 0x413   :  { %573 = dma.vmem_to_hbm [thread:$0]  %s568_s8, 256, %s904_s2, [#allocation4], %s817_s19, %s817_s19, %s818_s20  }
 0x414   :  { %814 = dma.done.wait [#allocation4], 256  }
 0x415   :  { %815 = vsyncadd [#allocation4], 4294967040 }
 0x416   :  { %577 = vsyncpa [#allocation3], 1 }
 0x417   :  { %578 = vsyncpa [#allocation6], 1 }
 0x418   :  { %579 = vsyncpa [#allocation4], 1 }

</bundles_post_ra>
